<compile_context>
chip_gen: v7x
topology: tpu7x:2x2x1
jax: 0.10.0
libtpu: 0.0.40
codegen_flags: <defaults>
</compile_context>

<pallas_src>
import functools

import jax
import jax.numpy as jnp
import numpy as np
from jax import lax
from jax.experimental import pallas as pl
from jax.experimental.pallas import tpu as pltpu


def _round_up(x, m):
    return ((x + m - 1) // m) * m


def _xcorr_depthwise_kernel(x_ref, z_ref, o_ref, *, hz, wz, h_block, unroll):
    """Depthwise cross-correlation for one (channel-chunk, Ho-tile) grid cell.

    x_ref: (Hx_pad, Wx_pad, kc)  search features, resident across Ho tiles
    z_ref: (Hz,     Wz,     kc)  template "kernel", resident across Ho tiles
    o_ref: (h_block, Wo_pad, kc) output row-tile
    """
    wx_pad = x_ref.shape[1]
    wo_pad = o_ref.shape[1]
    kc = o_ref.shape[2]

    # bf16 multiplies only when BOTH inputs are bf16 (v6e/v7x VALU); otherwise
    # f32 end-to-end (v5e path / mixed dtypes) to avoid silent down-casts.
    bf16_in = (x_ref.dtype == jnp.bfloat16) and (z_ref.dtype == jnp.bfloat16)
    compute_dtype = jnp.bfloat16 if bf16_in else jnp.float32

    # Output-row offset of this Ho tile.
    r0 = pl.program_id(1) * h_block

    def dy_body(dy, acc):
        # Leading-dim dynamic slices of the VMEM refs: cheap, the last two
        # (sublane, lane) dims stay fully aligned.  Cast once per dy.
        rows = x_ref[pl.ds(r0 + dy, h_block), :, :].astype(compute_dtype)
        zrow = z_ref[pl.ds(dy, 1), :, :].astype(compute_dtype)   # (1, wz, kc)

        # Per-dy partial sum in the compute dtype; a single cast + f32 add
        # into the accumulator per dy (not per (dy, dx)).
        partial = rows[:, :wo_pad, :] * zrow[:, 0:1, :]
        for dx in range(1, wz):
            # Window shift along W on the XLU (roll), not via unaligned
            # sublane slices.  shift = wx_pad - dx == -dx (mod wx_pad):
            # shifted[:, j, :] = rows[:, j + dx, :] for the kept columns;
            # wrapped columns land past Wo and are discarded in the wrapper.
            shifted = pltpu.roll(rows, shift=wx_pad - dx, axis=1)
            partial = partial + shifted[:, :wo_pad, :] * zrow[:, dx:dx + 1, :]
        return acc + partial.astype(jnp.float32)

    acc0 = jnp.zeros((h_block, wo_pad, kc), jnp.float32)
    if unroll:
        # Small windows (e.g. 4x4 test shape): full static unroll is fine.
        acc = acc0
        for dy in range(hz):
            acc = dy_body(dy, acc)
    else:
        # Production 7x7 windows: fori_loop bounds vreg live ranges to one dy
        # row instead of a 49-way unroll.
        acc = lax.fori_loop(0, hz, dy_body, acc0)

    # Dense (multiple-of-8 sublane, multiple-of-128 lane) store.
    o_ref[...] = acc.astype(o_ref.dtype)


def ban_forward(z_f, x_f, bbox=None, *, h_block=None, kc_max=128):
    """BAN forward: depthwise cross-correlation of x_f (search) with z_f (template).

    Inputs are NCHW (PyTorch convention); output is NCHW.
    """
    del bbox  # unused by the head's feature computation

    b, c, hz, wz = z_f.shape
    bx, cx, hx, wx = x_f.shape
    assert b == bx and c == cx, "batch/channel mismatch between z_f and x_f"
    ho, wo = hx - hz + 1, wx - wz + 1

    # --- tiling / padding choices -------------------------------------------
    bf16_in = (x_f.dtype == jnp.bfloat16) and (z_f.dtype == jnp.bfloat16)
    if h_block is None:
        # f32 path (incl. v5e) uses 2x the vregs per row tile -> smaller tile.
        h_block = 8 if bf16_in else 4
    h_block = max(1, min(h_block, ho))        # output rows per grid step
    n_ho = pl.cdiv(ho, h_block)
    ho_pad = n_ho * h_block
    hx_pad = ho_pad + hz - 1                  # rows needed by the last Ho tile
    wx_pad = _round_up(wx, 8)                 # dense sublanes for the FMA tiles
    wo_pad = _round_up(wo, 8)                 # dense sublanes for the store

    K = b * c                                 # fold batch into the lane axis
    K_pad = _round_up(K, 128)                 # lane-dense (multiple of 128)
    kc = min(K_pad, kc_max)                   # one lane tile per grid step
    K_pad = _round_up(K_pad, kc)
    n_kc = K_pad // kc                        # outer "parallel" axis (megacore)

    # --- layout: NCHW -> (H, W, B*C), zero-padded ---------------------------
    # TODO(synk): this transpose + pad is a separate XLA op whose HBM traffic
    # can rival the kernel's at inference scale; emitting channel-last
    # features upstream (or fusing the layout change into the kernel via a
    # pl.ANY ref + manual DMA) would remove it.
    x_l = jnp.transpose(x_f, (2, 3, 0, 1)).reshape(hx, wx, K)
    z_l = jnp.transpose(z_f, (2, 3, 0, 1)).reshape(hz, wz, K)
    x_l = jnp.pad(x_l, ((0, hx_pad - hx), (0, wx_pad - wx), (0, K_pad - K)))
    z_l = jnp.pad(z_l, ((0, 0), (0, 0), (0, K_pad - K)))

    unroll = (hz * wz) <= 16                  # full unroll only for small windows

    kernel = functools.partial(
        _xcorr_depthwise_kernel, hz=hz, wz=wz, h_block=h_block, unroll=unroll)

    out = pl.pallas_call(
        kernel,
        out_shape=jax.ShapeDtypeStruct((ho_pad, wo_pad, K_pad), x_f.dtype),
        grid_spec=pltpu.PrefetchScalarGridSpec(
            num_scalar_prefetch=0,
            grid=(n_kc, n_ho),  # Ho-tile axis innermost: x/z blocks stay resident
            in_specs=[
                pl.BlockSpec((hx_pad, wx_pad, kc), lambda ci, hi: (0, 0, ci)),
                pl.BlockSpec((hz, wz, kc), lambda ci, hi: (0, 0, ci)),
            ],
            out_specs=pl.BlockSpec((h_block, wo_pad, kc),
                                   lambda ci, hi: (hi, 0, ci)),
        ),
        compiler_params=pltpu.CompilerParams(
            dimension_semantics=("parallel", "parallel")),
    )(x_l, z_l)

    # Strip padding (padded rows/cols hold roll-wrapped garbage and must never
    # be consumed directly), (Ho, Wo, B*C) -> NCHW.
    out = out[:ho, :wo, :K].reshape(ho, wo, b, c)
    return jnp.transpose(out, (2, 3, 0, 1))


def _reference_xcorr_depthwise(z_f, x_f):
    """Pure numpy reference (NCHW in / NCHW out)."""
    z = np.asarray(z_f)
    x = np.asarray(x_f)
    b, c, hz, wz = z.shape
    _, _, hx, wx = x.shape
    ho, wo = hx - hz + 1, wx - wz + 1
    out = np.zeros((b, c, ho, wo), dtype=np.float32)
    for dy in range(hz):
        for dx in range(wz):
            out += x[:, :, dy:dy + ho, dx:dx + wo] * z[:, :, dy:dy + 1, dx:dx + 1]
    return out


if __name__ == "__main__":
    key = jax.random.PRNGKey(0)
    k_z, k_x, k_b = jax.random.split(key, 3)

    B, C = 2, 32
    HZ, WZ = 4, 4      # template feature spatial size
    HX, WX = 12, 12    # search feature spatial size

    z_f = jax.random.normal(k_z, (B, C, HZ, WZ), dtype=jnp.float32)
    x_f = jax.random.normal(k_x, (B, C, HX, WX), dtype=jnp.float32)
    bbox = jax.random.uniform(k_b, (B, 4), dtype=jnp.float32)  # unused by the head

    out = jax.jit(ban_forward)(z_f, x_f, bbox)
    out = jax.block_until_ready(out)

    ref = _reference_xcorr_depthwise(z_f, x_f)
    np.testing.assert_allclose(np.asarray(out), ref, rtol=1e-5, atol=1e-5)

    print("KERNEL_OK")
</pallas_src>

<mosaic_0001>
module attributes {stable_mosaic.version = 11 : i64} {
  func.func @_xcorr_depthwise_kernel(%arg0: i32, %arg1: i32, %arg2: memref<15x16x128xf32, #tpu.memory_space<vmem>>, %arg3: memref<4x4x128xf32, #tpu.memory_space<vmem>>, %arg4: memref<4x16x128xf32, #tpu.memory_space<vmem>>) attributes {dimension_semantics = [#tpu.dimension_semantics<parallel>, #tpu.dimension_semantics<parallel>], iteration_bounds = array<i64: 1, 3>, scalar_prefetch = 0 : i64, scratch_operands = 0 : i64, tpu.core_type = #tpu.core_type<tc>, window_params = [{transform_indices = @transform_0, window_bounds = array<i64: 15, 16, 128>}, {transform_indices = @transform_1, window_bounds = array<i64: 4, 4, 128>}, {transform_indices = @transform_2, window_bounds = array<i64: 4, 16, 128>}]} {
    %c4_i32 = arith.constant 4 : i32
    %0 = arith.muli %arg1, %c4_i32 : i32
    %cst = arith.constant 0.000000e+00 : f32
    %1 = vector.broadcast %cst : f32 to vector<4x16x128xf32>
    %c0_i32 = arith.constant 0 : i32
    %2 = arith.addi %0, %c0_i32 : i32
    %3 = arith.index_cast %2 : i32 to index
    %c0 = arith.constant 0 : index
    %c0_0 = arith.constant 0 : index
    %4 = vector.load %arg2[%3, %c0, %c0_0] : memref<15x16x128xf32, #tpu.memory_space<vmem>>, vector<4x16x128xf32>
    %c0_1 = arith.constant 0 : index
    %c0_2 = arith.constant 0 : index
    %c0_3 = arith.constant 0 : index
    %5 = vector.load %arg3[%c0_1, %c0_2, %c0_3] : memref<4x4x128xf32, #tpu.memory_space<vmem>>, vector<1x4x128xf32>
    %6 = vector.extract_strided_slice %5 {offsets = [0, 0, 0], sizes = [1, 1, 128], strides = [1, 1, 1]} : vector<1x4x128xf32> to vector<1x1x128xf32>
    %7 = vector.broadcast %6 : vector<1x1x128xf32> to vector<4x16x128xf32>
    %8 = arith.mulf %4, %7 : vector<4x16x128xf32>
    %c15_i32 = arith.constant 15 : i32
    %9 = tpu.dynamic_rotate %4 by %c15_i32 dim 1 : vector<4x16x128xf32>, i32 -> vector<4x16x128xf32>
    %10 = vector.extract_strided_slice %5 {offsets = [0, 1, 0], sizes = [1, 1, 128], strides = [1, 1, 1]} : vector<1x4x128xf32> to vector<1x1x128xf32>
    %11 = vector.broadcast %10 : vector<1x1x128xf32> to vector<4x16x128xf32>
    %12 = arith.mulf %9, %11 : vector<4x16x128xf32>
    %13 = arith.addf %8, %12 : vector<4x16x128xf32>
    %c14_i32 = arith.constant 14 : i32
    %14 = tpu.dynamic_rotate %4 by %c14_i32 dim 1 : vector<4x16x128xf32>, i32 -> vector<4x16x128xf32>
    %15 = vector.extract_strided_slice %5 {offsets = [0, 2, 0], sizes = [1, 1, 128], strides = [1, 1, 1]} : vector<1x4x128xf32> to vector<1x1x128xf32>
    %16 = vector.broadcast %15 : vector<1x1x128xf32> to vector<4x16x128xf32>
    %17 = arith.mulf %14, %16 : vector<4x16x128xf32>
    %18 = arith.addf %13, %17 : vector<4x16x128xf32>
    %c13_i32 = arith.constant 13 : i32
    %19 = tpu.dynamic_rotate %4 by %c13_i32 dim 1 : vector<4x16x128xf32>, i32 -> vector<4x16x128xf32>
    %20 = vector.extract_strided_slice %5 {offsets = [0, 3, 0], sizes = [1, 1, 128], strides = [1, 1, 1]} : vector<1x4x128xf32> to vector<1x1x128xf32>
    %21 = vector.broadcast %20 : vector<1x1x128xf32> to vector<4x16x128xf32>
    %22 = arith.mulf %19, %21 : vector<4x16x128xf32>
    %23 = arith.addf %18, %22 : vector<4x16x128xf32>
    %24 = arith.addf %1, %23 : vector<4x16x128xf32>
    %c1_i32 = arith.constant 1 : i32
    %25 = arith.addi %0, %c1_i32 : i32
    %26 = arith.index_cast %25 : i32 to index
    %c0_4 = arith.constant 0 : index
    %c0_5 = arith.constant 0 : index
    %27 = vector.load %arg2[%26, %c0_4, %c0_5] : memref<15x16x128xf32, #tpu.memory_space<vmem>>, vector<4x16x128xf32>
    %c1 = arith.constant 1 : index
    %c0_6 = arith.constant 0 : index
    %c0_7 = arith.constant 0 : index
    %28 = vector.load %arg3[%c1, %c0_6, %c0_7] : memref<4x4x128xf32, #tpu.memory_space<vmem>>, vector<1x4x128xf32>
    %29 = vector.extract_strided_slice %28 {offsets = [0, 0, 0], sizes = [1, 1, 128], strides = [1, 1, 1]} : vector<1x4x128xf32> to vector<1x1x128xf32>
    %30 = vector.broadcast %29 : vector<1x1x128xf32> to vector<4x16x128xf32>
    %31 = arith.mulf %27, %30 : vector<4x16x128xf32>
    %c15_i32_8 = arith.constant 15 : i32
    %32 = tpu.dynamic_rotate %27 by %c15_i32_8 dim 1 : vector<4x16x128xf32>, i32 -> vector<4x16x128xf32>
    %33 = vector.extract_strided_slice %28 {offsets = [0, 1, 0], sizes = [1, 1, 128], strides = [1, 1, 1]} : vector<1x4x128xf32> to vector<1x1x128xf32>
    %34 = vector.broadcast %33 : vector<1x1x128xf32> to vector<4x16x128xf32>
    %35 = arith.mulf %32, %34 : vector<4x16x128xf32>
    %36 = arith.addf %31, %35 : vector<4x16x128xf32>
    %c14_i32_9 = arith.constant 14 : i32
    %37 = tpu.dynamic_rotate %27 by %c14_i32_9 dim 1 : vector<4x16x128xf32>, i32 -> vector<4x16x128xf32>
    %38 = vector.extract_strided_slice %28 {offsets = [0, 2, 0], sizes = [1, 1, 128], strides = [1, 1, 1]} : vector<1x4x128xf32> to vector<1x1x128xf32>
    %39 = vector.broadcast %38 : vector<1x1x128xf32> to vector<4x16x128xf32>
    %40 = arith.mulf %37, %39 : vector<4x16x128xf32>
    %41 = arith.addf %36, %40 : vector<4x16x128xf32>
    %c13_i32_10 = arith.constant 13 : i32
    %42 = tpu.dynamic_rotate %27 by %c13_i32_10 dim 1 : vector<4x16x128xf32>, i32 -> vector<4x16x128xf32>
    %43 = vector.extract_strided_slice %28 {offsets = [0, 3, 0], sizes = [1, 1, 128], strides = [1, 1, 1]} : vector<1x4x128xf32> to vector<1x1x128xf32>
    %44 = vector.broadcast %43 : vector<1x1x128xf32> to vector<4x16x128xf32>
    %45 = arith.mulf %42, %44 : vector<4x16x128xf32>
    %46 = arith.addf %41, %45 : vector<4x16x128xf32>
    %47 = arith.addf %24, %46 : vector<4x16x128xf32>
    %c2_i32 = arith.constant 2 : i32
    %48 = arith.addi %0, %c2_i32 : i32
    %49 = arith.index_cast %48 : i32 to index
    %c0_11 = arith.constant 0 : index
    %c0_12 = arith.constant 0 : index
    %50 = vector.load %arg2[%49, %c0_11, %c0_12] : memref<15x16x128xf32, #tpu.memory_space<vmem>>, vector<4x16x128xf32>
    %c2 = arith.constant 2 : index
    %c0_13 = arith.constant 0 : index
    %c0_14 = arith.constant 0 : index
    %51 = vector.load %arg3[%c2, %c0_13, %c0_14] : memref<4x4x128xf32, #tpu.memory_space<vmem>>, vector<1x4x128xf32>
    %52 = vector.extract_strided_slice %51 {offsets = [0, 0, 0], sizes = [1, 1, 128], strides = [1, 1, 1]} : vector<1x4x128xf32> to vector<1x1x128xf32>
    %53 = vector.broadcast %52 : vector<1x1x128xf32> to vector<4x16x128xf32>
    %54 = arith.mulf %50, %53 : vector<4x16x128xf32>
    %c15_i32_15 = arith.constant 15 : i32
    %55 = tpu.dynamic_rotate %50 by %c15_i32_15 dim 1 : vector<4x16x128xf32>, i32 -> vector<4x16x128xf32>
    %56 = vector.extract_strided_slice %51 {offsets = [0, 1, 0], sizes = [1, 1, 128], strides = [1, 1, 1]} : vector<1x4x128xf32> to vector<1x1x128xf32>
    %57 = vector.broadcast %56 : vector<1x1x128xf32> to vector<4x16x128xf32>
    %58 = arith.mulf %55, %57 : vector<4x16x128xf32>
    %59 = arith.addf %54, %58 : vector<4x16x128xf32>
    %c14_i32_16 = arith.constant 14 : i32
    %60 = tpu.dynamic_rotate %50 by %c14_i32_16 dim 1 : vector<4x16x128xf32>, i32 -> vector<4x16x128xf32>
    %61 = vector.extract_strided_slice %51 {offsets = [0, 2, 0], sizes = [1, 1, 128], strides = [1, 1, 1]} : vector<1x4x128xf32> to vector<1x1x128xf32>
    %62 = vector.broadcast %61 : vector<1x1x128xf32> to vector<4x16x128xf32>
    %63 = arith.mulf %60, %62 : vector<4x16x128xf32>
    %64 = arith.addf %59, %63 : vector<4x16x128xf32>
    %c13_i32_17 = arith.constant 13 : i32
    %65 = tpu.dynamic_rotate %50 by %c13_i32_17 dim 1 : vector<4x16x128xf32>, i32 -> vector<4x16x128xf32>
    %66 = vector.extract_strided_slice %51 {offsets = [0, 3, 0], sizes = [1, 1, 128], strides = [1, 1, 1]} : vector<1x4x128xf32> to vector<1x1x128xf32>
    %67 = vector.broadcast %66 : vector<1x1x128xf32> to vector<4x16x128xf32>
    %68 = arith.mulf %65, %67 : vector<4x16x128xf32>
    %69 = arith.addf %64, %68 : vector<4x16x128xf32>
    %70 = arith.addf %47, %69 : vector<4x16x128xf32>
    %c3_i32 = arith.constant 3 : i32
    %71 = arith.addi %0, %c3_i32 : i32
    %72 = arith.index_cast %71 : i32 to index
    %c0_18 = arith.constant 0 : index
    %c0_19 = arith.constant 0 : index
    %73 = vector.load %arg2[%72, %c0_18, %c0_19] : memref<15x16x128xf32, #tpu.memory_space<vmem>>, vector<4x16x128xf32>
    %c3 = arith.constant 3 : index
    %c0_20 = arith.constant 0 : index
    %c0_21 = arith.constant 0 : index
    %74 = vector.load %arg3[%c3, %c0_20, %c0_21] : memref<4x4x128xf32, #tpu.memory_space<vmem>>, vector<1x4x128xf32>
    %75 = vector.extract_strided_slice %74 {offsets = [0, 0, 0], sizes = [1, 1, 128], strides = [1, 1, 1]} : vector<1x4x128xf32> to vector<1x1x128xf32>
    %76 = vector.broadcast %75 : vector<1x1x128xf32> to vector<4x16x128xf32>
    %77 = arith.mulf %73, %76 : vector<4x16x128xf32>
    %c15_i32_22 = arith.constant 15 : i32
    %78 = tpu.dynamic_rotate %73 by %c15_i32_22 dim 1 : vector<4x16x128xf32>, i32 -> vector<4x16x128xf32>
    %79 = vector.extract_strided_slice %74 {offsets = [0, 1, 0], sizes = [1, 1, 128], strides = [1, 1, 1]} : vector<1x4x128xf32> to vector<1x1x128xf32>
    %80 = vector.broadcast %79 : vector<1x1x128xf32> to vector<4x16x128xf32>
    %81 = arith.mulf %78, %80 : vector<4x16x128xf32>
    %82 = arith.addf %77, %81 : vector<4x16x128xf32>
    %c14_i32_23 = arith.constant 14 : i32
    %83 = tpu.dynamic_rotate %73 by %c14_i32_23 dim 1 : vector<4x16x128xf32>, i32 -> vector<4x16x128xf32>
    %84 = vector.extract_strided_slice %74 {offsets = [0, 2, 0], sizes = [1, 1, 128], strides = [1, 1, 1]} : vector<1x4x128xf32> to vector<1x1x128xf32>
    %85 = vector.broadcast %84 : vector<1x1x128xf32> to vector<4x16x128xf32>
    %86 = arith.mulf %83, %85 : vector<4x16x128xf32>
    %87 = arith.addf %82, %86 : vector<4x16x128xf32>
    %c13_i32_24 = arith.constant 13 : i32
    %88 = tpu.dynamic_rotate %73 by %c13_i32_24 dim 1 : vector<4x16x128xf32>, i32 -> vector<4x16x128xf32>
    %89 = vector.extract_strided_slice %74 {offsets = [0, 3, 0], sizes = [1, 1, 128], strides = [1, 1, 1]} : vector<1x4x128xf32> to vector<1x1x128xf32>
    %90 = vector.broadcast %89 : vector<1x1x128xf32> to vector<4x16x128xf32>
    %91 = arith.mulf %88, %90 : vector<4x16x128xf32>
    %92 = arith.addf %87, %91 : vector<4x16x128xf32>
    %93 = arith.addf %70, %92 : vector<4x16x128xf32>
    %c0_25 = arith.constant 0 : index
    %c0_26 = arith.constant 0 : index
    %c0_27 = arith.constant 0 : index
    %94 = vector.load %arg4[%c0_25, %c0_26, %c0_27] : memref<4x16x128xf32, #tpu.memory_space<vmem>>, vector<4x16x128xf32>
    tpu.vector_store %arg4[%c0_25, %c0_26, %c0_27], %93 {strides = array<i32>} : memref<4x16x128xf32, #tpu.memory_space<vmem>>, vector<4x16x128xf32>,
    return
  }
  func.func @transform_0(%arg0: i32, %arg1: i32) -> (i32, i32, i32) {
    %c0_i32 = arith.constant 0 : i32
    %c0_i32_0 = arith.constant 0 : i32
    %c0_i32_1 = arith.constant 0 : i32
    return %c0_i32, %c0_i32_0, %arg0 : i32, i32, i32
  }
  func.func @transform_1(%arg0: i32, %arg1: i32) -> (i32, i32, i32) {
    %c0_i32 = arith.constant 0 : i32
    %c0_i32_0 = arith.constant 0 : i32
    %c0_i32_1 = arith.constant 0 : i32
    return %c0_i32, %c0_i32_0, %arg0 : i32, i32, i32
  }
  func.func @transform_2(%arg0: i32, %arg1: i32) -> (i32, i32, i32) {
    %c0_i32 = arith.constant 0 : i32
    %c0_i32_0 = arith.constant 0 : i32
    return %arg1, %c0_i32, %arg0 : i32, i32, i32
  }
}

</mosaic_0001>

<bundles_post_ra>
// kernel: ban_forward.1
= control target key start
LH: loop header
LB: loop body
LE: loop exit
PB: predicated region body
PF: predicated region fallthrough
CT: control target
= control target key end

     0   :  { %s984_s9 = smov 0   ;;  %s986_s10 = smov 0   ;;  %s1527_s0 = inlined_call_operand.vmem [shape: f32[15,16,128], index: 0, kind: input, shape index: {}]   ;;  %s1528_s1 = inlined_call_operand.vmem [shape: f32[4,4,128], index: 1, kind: input, shape index: {}]   ;;  %s1529_s2 = inlined_call_operand.vmem [shape: f32[12,16,128], index: 2, kind: output, shape index: {}]  }
   0x1   :  { %s988_s11 = smov 0  }
   0x2 LB: > { %s21_s12 = sadd.s32 1, %s963_s10  ;;  %p875_p0 = scmp.ge.s32.totalorder %s967_s11, 1  ;;  %s967_s11 = sphi %s988_s11, %s12_s11   ;;  %s963_s10 = sphi %s986_s10, %s1594_s10   ;;  %s959_s9 = sphi %s984_s9, %s1593_s9  }
   0x3   : > { %p22_p1 = scmp.ge.s32.totalorder %s21_s12, 3  ;;  %p134_p2 = scmp.lt.s32.totalorder %s967_s11, 4 }
   0x5   : > { %s1596_s12 = smov (%p22_p1, %s21_s12), 0  ;;  %p135_p3 = pnand %p875_p0, %p134_p2 }
   0x7   : > { %138 = sbr.rel (%p135_p3) target bundleno = 111 (0x6f), region = 28 }
   0xe   : > { %s917_s13 = sshll.u32 %s959_s9, 6  ;;  %v193_v0 = vlaneseq  ;;  %v1013_v1 = vld [vmem:[%s1528_s1] sm:$0xf]  ;;  %s876_s25 = sshll.u32 %s959_s9, 2 }
   0xf   : > { %s1008_s16 = scalar_lea.vmem %s1527_s0, %s917_s13  ;;  %p1478_p4 = scmp.lt.s32.totalorder %s876_s25, 11 }
  0x10   : > { %v1016_v2 = vld [vmem:[%s1008_s16] sm:$0xff]  ;;  %v1019_v3 = vld [vmem:[%s1008_s16 + $0x8] sm:$0xff]  ;;  %v1022_v4 = vld [vmem:[%s1008_s16 + $0x10] sm:$0xff]  ;;  %v1024_v5 = vshrl.u32 %v193_v0, 7 }
  0x11   : > { %v1027_v6 = vld [vmem:[%s1008_s16 + $0x18] sm:$0xff]  ;;  %v1030_v7 = vld [vmem:[%s1008_s16 + $0x20] sm:$0xff]  ;;  %v1033_v8 = vld [vmem:[%s1008_s16 + $0x28] sm:$0xff]  ;;  %v205_v9 = vrot.slane %v1016_v2, 1  ;;  %v206_v10 = vrot.slane %v1022_v4, 1  ;;  %v209_v15 = vrot.slane %v1019_v3, 1 }
  0x12   : > { %1551 = vst [vmem:[#allocation2_spill] sm:$0xff] %v1030_v7  ;;  %1552 = vst [vmem:[#allocation3_spill] sm:$0xff] %v1033_v8  ;;  %v1038_v11 = vld [vmem:[%s1008_s16 + $0x30] sm:$0xff]  ;;  %v1041_v12 = vld [vmem:[%s1008_s16 + $0x38] sm:$0xff]  ;;  %v1044_v13 = vsub.s32 0, %v1024_v5  ;;  %v207_v14 = vrot.slane %v1030_v7, 1 }
  0x13   : > { %1553 = vst [vmem:[#allocation4_spill] sm:$0xff] %v1038_v11  ;;  %1554 = vst [vmem:[#allocation5_spill] sm:$0xff] %v1041_v12  ;;  %v210_v16 = vrot.slane %v1027_v6, 1  ;;  %v208_v17 = vrot.slane %v1038_v11, 1  ;;  %v211_v18 = vrot.slane %v1033_v8, 1  ;;  %v212_v19 = vrot.slane %v1041_v12, 1 }
  0x14   : > { %vm215_vm0 = vcmp.lt.s32.totalorder %v1024_v5, 7  ;;  %v196_v20 = vrot.slane %v1013_v1, %v1044_v13  ;;  %v1085_v33 = vsub.s32 1, %v1024_v5  ;;  %v244_v37 = vrot.slane %v1016_v2, 2  ;;  %s1598_s25 = smov (!%p1478_p4, %s876_s25), 11 }
  0x15   : > { %v216_v21 = vsel %vm215_vm0, %v205_v9, %v209_v15  ;;  %v1059_v22 = vsel %vm215_vm0, %v206_v10, %v210_v16  ;;  %v1063_v23 = vsel %vm215_vm0, %v207_v14, %v211_v18  ;;  %v1067_v24 = vsel %vm215_vm0, %v208_v17, %v212_v19  ;;  %s916_s27 = sshll.u32 %s1598_s25, 4 }
  0x16   : > { %1555 = vst [vmem:[#allocation6_spill] sm:$0xff] %v1063_v23  ;;  %1556 = vst [vmem:[#allocation7_spill] sm:$0xff] %v1067_v24  ;;  %v220_v25 = vsel %vm215_vm0, %v209_v15, %v205_v9  ;;  %v197_v26 = vmul.f32 %v196_v20, %v1016_v2  ;;  %v198_v27 = vmul.f32 %v196_v20, %v1019_v3  ;;  %v245_v39 = vrot.slane %v1022_v4, 2  ;;  %s179_s30 = scalar_lea.vmem %s1529_s2, %s916_s27 }
  0x17   : > { %v1075_v28 = vsel %vm215_vm0, %v210_v16, %v206_v10  ;;  %v1079_v29 = vsel %vm215_vm0, %v211_v18, %v207_v14  ;;  %v199_v30 = vmul.f32 %v196_v20, %v1022_v4  ;;  %v200_v31 = vmul.f32 %v196_v20, %v1027_v6  ;;  %1557 = vst [vmem:[#allocation8_spill] sm:$0xff] %v1085_v33 }
  0x18   : > { %v201_v32 = vmul.f32 %v196_v20, %v1030_v7  ;;  %v202_v34 = vmul.f32 %v196_v20, %v1033_v8  ;;  %v203_v35 = vmul.f32 %v196_v20, %v1038_v11  ;;  %v1091_v36 = vsel %vm215_vm0, %v212_v19, %v208_v17 }
  0x19   : > { %1558 = vst [vmem:[#allocation9_spill] sm:$0xff] %v1091_v36  ;;  %v227_v38 = vrot.slane %v1013_v1, %v1085_v33  ;;  %v248_v40 = vrot.slane %v1019_v3, 2  ;;  %v249_v41 = vrot.slane %v1027_v6, 2  ;;  %v204_v42 = vmul.f32 %v196_v20, %v1041_v12 }
  0x1a   : > { %v246_v43 = vrot.slane %v1030_v7, 2  ;;  %v250_v44 = vrot.slane %v1033_v8, 2  ;;  %vm252_vm1 = vcmp.lt.s32.totalorder %v1024_v5, 6  ;;  %v247_v53 = vrot.slane %v1038_v11, 2 }
  0x1b   : > { %v228_v45 = vmul.f32 %v227_v38, %v216_v21  ;;  %v229_v46 = vmul.f32 %v227_v38, %v220_v25  ;;  %v230_v47 = vmul.f32 %v227_v38, %v1059_v22  ;;  %v231_v48 = vmul.f32 %v227_v38, %v1075_v28 }
  0x1c   : > { %v232_v49 = vmul.f32 %v227_v38, %v1063_v23  ;;  %v233_v50 = vmul.f32 %v227_v38, %v1079_v29  ;;  %v234_v51 = vmul.f32 %v227_v38, %v1067_v24  ;;  %v235_v52 = vmul.f32 %v227_v38, %v1091_v36 }
  0x1d   : > { %v251_v54 = vrot.slane %v1041_v12, 2  ;;  %v253_v55 = vsel %vm252_vm1, %v244_v37, %v248_v40  ;;  %v1115_v56 = vsel %vm252_vm1, %v245_v39, %v249_v41  ;;  %v236_v57 = vadd.f32 %v228_v45, %v197_v26 }
  0x1e   : > { %v237_v58 = vadd.f32 %v229_v46, %v198_v27  ;;  %v257_v59 = vsel %vm252_vm1, %v248_v40, %v244_v37  ;;  %v1121_v60 = vsel %vm252_vm1, %v249_v41, %v245_v39  ;;  %v238_v61 = vadd.f32 %v230_v47, %v199_v30 }
  0x1f   : > { %v239_v62 = vadd.f32 %v231_v48, %v200_v31  ;;  %v240_v63 = vadd.f32 %v232_v49, %v201_v32  ;;  %v241_v0 = vadd.f32 %v233_v50, %v202_v34  ;;  %v242_v9 = vadd.f32 %v234_v51, %v203_v35  ;;  %v1183_v51 = vld [vmem:[%s1008_s16 + $0x40] sm:$0xff] }
  0x20   : > { %v243_v10 = vadd.f32 %v235_v52, %v204_v42  ;;  %v1125_v14 = vsel %vm252_vm1, %v246_v43, %v250_v44  ;;  %v1128_v15 = vsub.s32 2, %v1024_v5  ;;  %v1132_v16 = vsel %vm252_vm1, %v247_v53, %v251_v54  ;;  %1560 = vst [vmem:[#allocation11_spill] sm:$0xff] %v1183_v51  ;;  %v1186_v52 = vld [vmem:[%s1008_s16 + $0x48] sm:$0xff] }
  0x21   : > { %v1136_v17 = vsel %vm252_vm1, %v250_v44, %v246_v43  ;;  %v1140_v18 = vsel %vm252_vm1, %v251_v54, %v247_v53  ;;  %v281_v19 = vrot.slane %v1016_v2, 3  ;;  %v282_v21 = vrot.slane %v1022_v4, 3  ;;  %1561 = vst [vmem:[#allocation12_spill] sm:$0xff] %v1186_v52  ;;  %v1191_v53 = vld [vmem:[%s1528_s1 + $0x4] sm:$0xf] }
  0x22   : > { %1559 = vst [vmem:[#allocation10_spill] sm:$0xff] %v1128_v15  ;;  %v264_v20 = vrot.slane %v1013_v1, %v1128_v15  ;;  %v283_v25 = vrot.slane %v1030_v7, 3  ;;  %v285_v26 = vrot.slane %v1019_v3, 3  ;;  %v286_v27 = vrot.slane %v1027_v6, 3 }
  0x23   : > { %v287_v30 = vrot.slane %v1033_v8, 3  ;;  %vm289_vm2 = vcmp.lt.s32.totalorder %v1024_v5, 5  ;;  %v1152_v31 = vsub.s32 3, %v1024_v5  ;;  %v284_v40 = vrot.slane %v1038_v11, 3 }
  0x24   : > { %v265_v32 = vmul.f32 %v264_v20, %v253_v55  ;;  %v266_v2 = vmul.f32 %v264_v20, %v257_v59  ;;  %v267_v34 = vmul.f32 %v264_v20, %v1115_v56  ;;  %v268_v35 = vmul.f32 %v264_v20, %v1121_v60 }
  0x25   : > { %v269_v37 = vmul.f32 %v264_v20, %v1125_v14  ;;  %v270_v3 = vmul.f32 %v264_v20, %v1136_v17  ;;  %v271_v38 = vmul.f32 %v264_v20, %v1132_v16  ;;  %v272_v39 = vmul.f32 %v264_v20, %v1140_v18 }
  0x26   : > { %v288_v41 = vrot.slane %v1041_v12, 3  ;;  %v290_v42 = vsel %vm289_vm2, %v281_v19, %v285_v26  ;;  %v273_v43 = vadd.f32 %v265_v32, %v236_v57  ;;  %v1166_v44 = vsel %vm289_vm2, %v282_v21, %v286_v27 }
  0x27   : > { %v1170_v45 = vsel %vm289_vm2, %v283_v25, %v287_v30  ;;  %v294_v46 = vsel %vm289_vm2, %v285_v26, %v281_v19  ;;  %v1174_v47 = vadd.f32 %v266_v2, %v237_v58  ;;  %v1176_v48 = vadd.f32 %v267_v34, %v238_v61 }
  0x28   : > { %v1178_v49 = vadd.f32 %v268_v35, %v239_v62  ;;  %v1180_v50 = vadd.f32 %v269_v37, %v240_v63  ;;  %v1193_v54 = vadd.f32 %v270_v3, %v241_v0  ;;  %v1195_v55 = vadd.f32 %v271_v38, %v242_v9 }
  0x29   : > { %v1197_v57 = vadd.f32 %v272_v39, %v243_v10  ;;  %v301_v58 = vrot.slane %v1013_v1, %v1152_v31  ;;  %v1203_v59 = vsel %vm289_vm2, %v284_v40, %v288_v41  ;;  %v1207_v61 = vsel %vm289_vm2, %v286_v27, %v282_v21 }
  0x2a   : > { %v1211_v62 = vsel %vm289_vm2, %v287_v30, %v283_v25  ;;  %v1215_v63 = vsel %vm289_vm2, %v288_v41, %v284_v40  ;;  %v342_v1 = vrot.slane %v1191_v53, %v1044_v13  ;;  %v354_v9 = vrot.slane %v1183_v51, 1 }
  0x2b   : > { %1562 = vst [vmem:[#allocation13_spill] sm:$0xff] %v1197_v57  ;;  %v302_v0 = vmul.f32 %v301_v58, %v290_v42  ;;  %v358_v10 = vrot.slane %v1186_v52, 1  ;;  %v370_v19 = vrot.slane %v1191_v53, %v1085_v33  ;;  %v390_v20 = vrot.slane %v1183_v51, 2 }
  0x2c   : > { %v394_v21 = vrot.slane %v1186_v52, 2  ;;  %v406_v25 = vrot.slane %v1191_v53, %v1128_v15  ;;  %v303_v26 = vmul.f32 %v301_v58, %v294_v46  ;;  %v304_v27 = vmul.f32 %v301_v58, %v1166_v44 }
  0x2d   : > { %v305_v30 = vmul.f32 %v301_v58, %v1207_v61  ;;  %v306_v32 = vmul.f32 %v301_v58, %v1170_v45  ;;  %v307_v2 = vmul.f32 %v301_v58, %v1211_v62  ;;  %v1232_v34 = vmul.f32 %v301_v58, %v1203_v59 }
  0x2e   : > { %v1235_v35 = vmul.f32 %v301_v58, %v1215_v63  ;;  %v1237_v37 = vadd.f32 %v302_v0, %v273_v43  ;;  %v343_v3 = vmul.f32 %v342_v1, %v1022_v4  ;;  %v344_v38 = vmul.f32 %v342_v1, %v1027_v6 }
  0x2f   : > { %v345_v39 = vmul.f32 %v342_v1, %v1030_v7  ;;  %v346_v40 = vmul.f32 %v342_v1, %v1033_v8  ;;  %v347_v41 = vmul.f32 %v342_v1, %v1038_v11  ;;  %v348_v42 = vmul.f32 %v342_v1, %v1041_v12 }
  0x30   : > { %1563 = vst [vmem:[#allocation14_spill] sm:$0xff] %v1235_v35  ;;  %1564 = vst [vmem:[#allocation15_spill] sm:$0xff] %v1237_v37  ;;  %v349_v46 = vmul.f32 %v1183_v51, %v342_v1  ;;  %v350_v15 = vmul.f32 %v1186_v52, %v342_v1  ;;  %v1249_v43 = vsel %vm215_vm0, %v354_v9, %v358_v10 }
  0x31   : > { %1565 = vst [vmem:[#allocation16_spill] sm:$0xff] %v1249_v43  ;;  %v1253_v4 = vsel %vm215_vm0, %v358_v10, %v354_v9  ;;  %v371_v6 = vmul.f32 %v370_v19, %v1059_v22  ;;  %v372_v58 = vmul.f32 %v370_v19, %v1075_v28  ;;  %v373_v0 = vmul.f32 %v370_v19, %v1063_v23 }
  0x32   : > { %1566 = vst [vmem:[#allocation17_spill] sm:$0xff] %v1253_v4  ;;  %v374_v12 = vmul.f32 %v370_v19, %v1079_v29  ;;  %v375_v11 = vmul.f32 %v370_v19, %v1067_v24  ;;  %v376_v1 = vmul.f32 %v370_v19, %v1091_v36  ;;  %v377_v8 = vmul.f32 %v370_v19, %v1249_v43 }
  0x33   : > { %v378_v7 = vmul.f32 %v370_v19, %v1253_v4  ;;  %v379_v37 = vadd.f32 %v371_v6, %v343_v3  ;;  %v380_v33 = vadd.f32 %v372_v58, %v344_v38  ;;  %v381_v9 = vadd.f32 %v373_v0, %v345_v39 }
  0x34   : > { %v382_v10 = vadd.f32 %v374_v12, %v346_v40  ;;  %v383_v35 = vadd.f32 %v375_v11, %v347_v41  ;;  %v384_v22 = vadd.f32 %v376_v1, %v348_v42  ;;  %v385_v57 = vadd.f32 %v377_v8, %v349_v46  ;;  %v1567_v1 = vld [vmem:[#allocation13_spill] sm:$0xff] }
  0x35   : > { %v386_v28 = vadd.f32 %v378_v7, %v350_v15  ;;  %v1265_v23 = vsel %vm252_vm1, %v390_v20, %v394_v21  ;;  %v1269_v24 = vsel %vm252_vm1, %v394_v21, %v390_v20  ;;  %v407_v43 = vmul.f32 %v406_v25, %v1115_v56 }
  0x36   : > { %v408_v19 = vmul.f32 %v406_v25, %v1121_v60  ;;  %v409_v3 = vmul.f32 %v406_v25, %v1125_v14  ;;  %v410_v12 = vmul.f32 %v406_v25, %v1136_v17  ;;  %v411_v11 = vmul.f32 %v406_v25, %v1132_v16 }
  0x37   : > { %v412_v7 = vmul.f32 %v406_v25, %v1140_v18  ;;  %v413_v8 = vmul.f32 %v406_v25, %v1265_v23  ;;  %v414_v15 = vmul.f32 %v406_v25, %v1269_v24  ;;  %v1280_v38 = vadd.f32 %v303_v26, %v1174_v47 }
  0x38   : > { %v1283_v20 = vadd.f32 %v304_v27, %v1176_v48  ;;  %v1286_v56 = vadd.f32 %v305_v30, %v1178_v49  ;;  %v1289_v60 = vadd.f32 %v306_v32, %v1180_v50  ;;  %v1292_v21 = vadd.f32 %v307_v2, %v1193_v54  ;;  %v902_v54 = vld [vmem:[%s1528_s1 + $0x8] sm:$0xf] }
  0x39   : > { %v415_v39 = vadd.f32 %v407_v43, %v379_v37  ;;  %v416_v40 = vadd.f32 %v408_v19, %v380_v33  ;;  %v417_v25 = vadd.f32 %v409_v3, %v381_v9  ;;  %v418_v41 = vadd.f32 %v410_v12, %v382_v10  ;;  %v1568_v9 = vld [vmem:[#allocation14_spill] sm:$0xff]  ;;  %v1569_v12 = vld [vmem:[#allocation8_spill] sm:$0xff] }
  0x3a   : > { %v426_v47 = vrot.slane %v1183_v51, 3  ;;  %v430_v48 = vrot.slane %v1186_v52, 3  ;;  %v442_v49 = vrot.slane %v1191_v53, %v1152_v31  ;;  %v419_v26 = vadd.f32 %v411_v11, %v383_v35  ;;  %v1312_v35 = vld [vmem:[%s1008_s16 + $0x50] sm:$0xff] }
  0x3b   : > { %v420_v27 = vadd.f32 %v412_v7, %v384_v22  ;;  %v421_v50 = vadd.f32 %v413_v8, %v385_v57  ;;  %v422_v30 = vadd.f32 %v414_v15, %v386_v28  ;;  %v1315_v57 = vld [vmem:[%s1008_s16 + $0x58] sm:$0xff]  ;;  %v1330_v10 = vadd.f32 %v1568_v9, %v1567_v1 }
  0x3c   : > { %v1303_v33 = vsel %vm289_vm2, %v426_v47, %v430_v48  ;;  %v1307_v32 = vsel %vm289_vm2, %v430_v48, %v426_v47  ;;  %v443_v2 = vmul.f32 %v442_v49, %v1166_v44  ;;  %v444_v53 = vmul.f32 %v442_v49, %v1207_v61  ;;  %v1570_v47 = vld [vmem:[#allocation15_spill] sm:$0xff]  ;;  %v1574_v1 = vld [vmem:[#allocation5_spill] sm:$0xff] }
  0x3d   : > { %v445_v37 = vmul.f32 %v442_v49, %v1170_v45  ;;  %v446_v42 = vmul.f32 %v442_v49, %v1211_v62  ;;  %v447_v46 = vmul.f32 %v442_v49, %v1203_v59  ;;  %v448_v43 = vmul.f32 %v442_v49, %v1215_v63 }
  0x3e   : > { %v449_v6 = vmul.f32 %v442_v49, %v1303_v33  ;;  %v450_v58 = vmul.f32 %v442_v49, %v1307_v32  ;;  %v451_v0 = vadd.f32 %v443_v2, %v415_v39  ;;  %v483_v44 = vrot.slane %v902_v54, %v1044_v13  ;;  %v1571_v49 = vld [vmem:[#allocation2_spill] sm:$0xff] }
  0x3f   : > { %v1326_v61 = vadd.f32 %v1232_v34, %v1195_v55  ;;  %v495_v22 = vrot.slane %v1312_v35, 1  ;;  %v499_v28 = vrot.slane %v1315_v57, 1  ;;  %v452_v19 = vadd.f32 %v444_v53, %v416_v40  ;;  %v1572_v40 = vld [vmem:[#allocation3_spill] sm:$0xff]  ;;  %v1573_v53 = vld [vmem:[#allocation4_spill] sm:$0xff] }
  0x40   : > { %v453_v3 = vadd.f32 %v445_v37, %v417_v25  ;;  %v511_v11 = vrot.slane %v902_v54, %v1569_v12  ;;  %v531_v7 = vrot.slane %v1312_v35, 2  ;;  %v454_v8 = vadd.f32 %v446_v42, %v418_v41 }
  0x41   : > { %v1336_v15 = vadd.f32 %v447_v46, %v419_v26  ;;  %v1338_v39 = vadd.f32 %v448_v43, %v420_v27  ;;  %v1340_v55 = vadd.f32 %v449_v6, %v421_v50  ;;  %v1342_v34 = vadd.f32 %v450_v58, %v422_v30  ;;  %v1577_v46 = vld [vmem:[#allocation6_spill] sm:$0xff]  ;;  %v1578_v58 = vld [vmem:[#allocation7_spill] sm:$0xff] }
  0x42   : > { %v1345_v48 = vadd.f32 %v451_v0, %v1570_v47  ;;  %v484_v2 = vmul.f32 %v483_v44, %v1571_v49  ;;  %v485_v25 = vmul.f32 %v483_v44, %v1572_v40  ;;  %v486_v37 = vmul.f32 %v483_v44, %v1573_v53  ;;  %v1579_v49 = vld [vmem:[#allocation16_spill] sm:$0xff]  ;;  %v1580_v53 = vld [vmem:[#allocation10_spill] sm:$0xff] }
  0x43   : > { %v487_v9 = vmul.f32 %v483_v44, %v1574_v1  ;;  %v488_v41 = vmul.f32 %v1183_v51, %v483_v44  ;;  %v489_v26 = vmul.f32 %v1186_v52, %v483_v44  ;;  %v490_v27 = vmul.f32 %v1312_v35, %v483_v44 }
  0x44   : > { %v491_v50 = vmul.f32 %v1315_v57, %v483_v44  ;;  %v1357_v30 = vsel %vm215_vm0, %v495_v22, %v499_v28  ;;  %v1361_v42 = vsel %vm215_vm0, %v499_v28, %v495_v22  ;;  %v512_v43 = vmul.f32 %v511_v11, %v1577_v46 }
  0x45   : > { %1575 = vst [vmem:[#allocation13_spill] sm:$0xff] %v1357_v30  ;;  %1576 = vst [vmem:[#allocation14_spill] sm:$0xff] %v1361_v42  ;;  %v513_v6 = vmul.f32 %v511_v11, %v1079_v29  ;;  %v514_v0 = vmul.f32 %v511_v11, %v1578_v58  ;;  %v515_v47 = vmul.f32 %v511_v11, %v1091_v36 }
  0x46   : > { %v516_v40 = vmul.f32 %v511_v11, %v1579_v49  ;;  %v517_v44 = vmul.f32 %v511_v11, %v1253_v4  ;;  %v518_v12 = vmul.f32 %v511_v11, %v1357_v30  ;;  %v519_v52 = vmul.f32 %v511_v11, %v1361_v42 }
  0x47   : > { %v1372_v51 = vadd.f32 %v452_v19, %v1280_v38  ;;  %v1375_v22 = vadd.f32 %v453_v3, %v1283_v20  ;;  %v1378_v29 = vadd.f32 %v454_v8, %v1286_v56  ;;  %v520_v28 = vadd.f32 %v512_v43, %v484_v2 }
  0x48   : > { %v521_v46 = vadd.f32 %v513_v6, %v485_v25  ;;  %v522_v36 = vadd.f32 %v514_v0, %v486_v37  ;;  %v523_v58 = vadd.f32 %v515_v47, %v487_v9  ;;  %v524_v49 = vadd.f32 %v516_v40, %v488_v41  ;;  %v1412_v0 = vld [vmem:[%s1528_s1 + $0xc] sm:$0xf] }
  0x49   : > { %v525_v1 = vadd.f32 %v517_v44, %v489_v26  ;;  %v526_v4 = vadd.f32 %v518_v12, %v490_v27  ;;  %v535_v30 = vrot.slane %v1315_v57, 2  ;;  %v547_v11 = vrot.slane %v902_v54, %v1580_v53  ;;  %v1423_v44 = vld [vmem:[%s1008_s16 + $0x60] sm:$0xff] }
  0x4a   : > { %v527_v42 = vadd.f32 %v519_v52, %v491_v50  ;;  %v567_v38 = vrot.slane %v1312_v35, 3  ;;  %v571_v20 = vrot.slane %v1315_v57, 3  ;;  %v583_v19 = vrot.slane %v902_v54, %v1152_v31 }
  0x4b   : > { %v1387_v56 = vsel %vm252_vm1, %v531_v7, %v535_v30  ;;  %v1391_v3 = vsel %vm252_vm1, %v535_v30, %v531_v7  ;;  %v548_v12 = vmul.f32 %v547_v11, %v1125_v14  ;;  %v549_v8 = vmul.f32 %v547_v11, %v1136_v17 }
  0x4c   : > { %v550_v52 = vmul.f32 %v547_v11, %v1132_v16  ;;  %v551_v2 = vmul.f32 %v547_v11, %v1140_v18  ;;  %v552_v25 = vmul.f32 %v547_v11, %v1265_v23  ;;  %v553_v54 = vmul.f32 %v547_v11, %v1269_v24 }
  0x4d   : > { %v554_v37 = vmul.f32 %v547_v11, %v1387_v56  ;;  %v555_v9 = vmul.f32 %v547_v11, %v1391_v3  ;;  %v556_v41 = vadd.f32 %v548_v12, %v520_v28  ;;  %v557_v26 = vadd.f32 %v549_v8, %v521_v46  ;;  %v1426_v28 = vld [vmem:[%s1008_s16 + $0x68] sm:$0xff] }
  0x4e   : > { %v558_v7 = vadd.f32 %v550_v52, %v522_v36  ;;  %v559_v27 = vadd.f32 %v551_v2, %v523_v58  ;;  %v560_v14 = vadd.f32 %v552_v25, %v524_v49  ;;  %v561_v17 = vadd.f32 %v553_v54, %v525_v1 }
  0x4f   : > { %v562_v50 = vadd.f32 %v554_v37, %v526_v4  ;;  %v563_v30 = vadd.f32 %v555_v9, %v527_v42  ;;  %v1403_v43 = vsel %vm289_vm2, %v567_v38, %v571_v20  ;;  %v1407_v6 = vsel %vm289_vm2, %v571_v20, %v567_v38 }
  0x50   : > { %v584_v36 = vmul.f32 %v583_v19, %v1170_v45  ;;  %v585_v58 = vmul.f32 %v583_v19, %v1211_v62  ;;  %v586_v4 = vmul.f32 %v583_v19, %v1203_v59  ;;  %v587_v1 = vmul.f32 %v583_v19, %v1215_v63 }
  0x51   : > { %v588_v42 = vmul.f32 %v583_v19, %v1303_v33  ;;  %v589_v47 = vmul.f32 %v583_v19, %v1307_v32  ;;  %v590_v49 = vmul.f32 %v583_v19, %v1403_v43  ;;  %v591_v40 = vmul.f32 %v583_v19, %v1407_v6 }
  0x52   : > { %v592_v46 = vadd.f32 %v584_v36, %v556_v41  ;;  %v593_v45 = vadd.f32 %v585_v58, %v557_v26  ;;  %v594_v11 = vadd.f32 %v586_v4, %v558_v7  ;;  %v624_v62 = vrot.slane %v1412_v0, %v1044_v13  ;;  %v1584_v41 = vld [vmem:[#allocation12_spill] sm:$0xff]  ;;  %v1586_v36 = vld [vmem:[#allocation7_spill] sm:$0xff]  ;;  %v1587_v4 = vld [vmem:[#allocation9_spill] sm:$0xff] }
  0x53   : > { %v463_v38 = vadd.f32 %v1336_v15, %v1289_v60  ;;  %v464_v20 = vadd.f32 %v1338_v39, %v1292_v21  ;;  %v465_v12 = vadd.f32 %v1340_v55, %v1326_v61  ;;  %v466_v19 = vadd.f32 %v1342_v34, %v1330_v10  ;;  %v1581_v10 = vld [vmem:[#allocation4_spill] sm:$0xff]  ;;  %v1582_v39 = vld [vmem:[#allocation5_spill] sm:$0xff]  ;;  %v1583_v34 = vld [vmem:[#allocation11_spill] sm:$0xff] }
  0x54   : > { %v595_v8 = vadd.f32 %v587_v1, %v559_v27  ;;  %v596_v52 = vadd.f32 %v588_v42, %v560_v14  ;;  %v636_v2 = vrot.slane %v1423_v44, 1  ;;  %v640_v25 = vrot.slane %v1426_v28, 1  ;;  %v1585_v14 = vld [vmem:[#allocation8_spill] sm:$0xff] }
  0x55   : > { %v597_v54 = vadd.f32 %v589_v47, %v561_v17  ;;  %v598_v13 = vadd.f32 %v590_v49, %v562_v50  ;;  %v599_v37 = vadd.f32 %v591_v40, %v563_v30  ;;  %v1441_v60 = vadd.f32 %v592_v46, %v1345_v48  ;;  %v1588_v42 = vld [vmem:[#allocation16_spill] sm:$0xff]  ;;  %v1589_v49 = vld [vmem:[#allocation17_spill] sm:$0xff] }
  0x56   : > { %v1444_v21 = vadd.f32 %v593_v45, %v1372_v51  ;;  %v1447_v61 = vadd.f32 %v594_v11, %v1375_v22  ;;  %v625_v15 = vmul.f32 %v624_v62, %v1581_v10  ;;  %v626_v55 = vmul.f32 %v624_v62, %v1582_v39  ;;  %v1590_v46 = vld [vmem:[#allocation13_spill] sm:$0xff]  ;;  %v1591_v11 = vld [vmem:[#allocation14_spill] sm:$0xff] }
  0x57   : > { %v627_v9 = vmul.f32 %v1583_v34, %v624_v62  ;;  %v628_v26 = vmul.f32 %v1584_v41, %v624_v62  ;;  %v629_v7 = vmul.f32 %v1312_v35, %v624_v62  ;;  %v630_v48 = vmul.f32 %v1315_v57, %v624_v62 }
  0x58   : > { %v631_v27 = vmul.f32 %v1423_v44, %v624_v62  ;;  %v644_v51 = vsel %vm215_vm0, %v636_v2, %v640_v25  ;;  %v648_v22 = vsel %vm215_vm0, %v640_v25, %v636_v2  ;;  %v652_v17 = vrot.slane %v1412_v0, %v1585_v14 }
  0x59   : > { %v632_v50 = vmul.f32 %v1426_v28, %v624_v62  ;;  %v672_v30 = vrot.slane %v1423_v44, 2  ;;  %v676_v35 = vrot.slane %v1426_v28, 2  ;;  %v688_v57 = vrot.slane %v1412_v0, %v1580_v53 }
  0x5a   : > { %v653_v58 = vmul.f32 %v652_v17, %v1586_v36  ;;  %v654_v1 = vmul.f32 %v652_v17, %v1587_v4  ;;  %v655_v47 = vmul.f32 %v652_v17, %v1588_v42  ;;  %v656_v40 = vmul.f32 %v652_v17, %v1589_v49 }
  0x5b   : > { %v657_v45 = vmul.f32 %v652_v17, %v1590_v46  ;;  %v658_v62 = vmul.f32 %v652_v17, %v1591_v11  ;;  %v659_v2 = vmul.f32 %v652_v17, %v644_v51  ;;  %v660_v25 = vmul.f32 %v652_v17, %v648_v22 }
  0x5c   : > { %v661_v10 = vadd.f32 %v653_v58, %v625_v15  ;;  %v662_v39 = vadd.f32 %v654_v1, %v626_v55  ;;  %v708_v34 = vrot.slane %v1423_v44, 3  ;;  %v712_v53 = vrot.slane %v1426_v28, 3 }
  0x5d   : > { %v663_v41 = vadd.f32 %v655_v47, %v627_v9  ;;  %v664_v14 = vadd.f32 %v656_v40, %v628_v26  ;;  %v665_v36 = vadd.f32 %v657_v45, %v629_v7  ;;  %v666_v4 = vadd.f32 %v658_v62, %v630_v48 }
  0x5e   : > { %v680_v51 = vsel %vm252_vm1, %v672_v30, %v676_v35  ;;  %v684_v15 = vsel %vm252_vm1, %v676_v35, %v672_v30  ;;  %v689_v44 = vmul.f32 %v688_v57, %v1132_v16  ;;  %v690_v28 = vmul.f32 %v688_v57, %v1140_v18 }
  0x5f   : > { %v667_v55 = vadd.f32 %v659_v2, %v631_v27  ;;  %v668_v22 = vadd.f32 %v660_v25, %v632_v50  ;;  %v691_v17 = vmul.f32 %v688_v57, %v1265_v23  ;;  %v692_v9 = vmul.f32 %v688_v57, %v1269_v24 }
  0x60   : > { %v693_v26 = vmul.f32 %v688_v57, %v1387_v56  ;;  %v694_v7 = vmul.f32 %v688_v57, %v1391_v3  ;;  %v695_v48 = vmul.f32 %v688_v57, %v680_v51  ;;  %v696_v58 = vmul.f32 %v688_v57, %v684_v15 }
  0x61   : > { %v603_v16 = vadd.f32 %v595_v8, %v1378_v29  ;;  %v604_v18 = vadd.f32 %v596_v52, %v463_v38  ;;  %v605_v27 = vadd.f32 %v597_v54, %v464_v20  ;;  %v606_v50 = vadd.f32 %v598_v13, %v465_v12 }
  0x62   : > { %v607_v30 = vadd.f32 %v599_v37, %v466_v19  ;;  %v697_v23 = vadd.f32 %v689_v44, %v661_v10  ;;  %v698_v35 = vadd.f32 %v690_v28, %v662_v39  ;;  %v699_v24 = vadd.f32 %v691_v17, %v663_v41 }
  0x63   : > { %v700_v1 = vadd.f32 %v692_v9, %v664_v14  ;;  %v716_v56 = vsel %vm289_vm2, %v708_v34, %v712_v53  ;;  %v720_v3 = vsel %vm289_vm2, %v712_v53, %v708_v34  ;;  %v724_v57 = vrot.slane %v1412_v0, %v1152_v31 }
  0x64   : > { %v701_v42 = vadd.f32 %v693_v26, %v665_v36  ;;  %v702_v29 = vadd.f32 %v694_v7, %v666_v4  ;;  %v703_v8 = vadd.f32 %v695_v48, %v667_v55  ;;  %v704_v38 = vadd.f32 %v696_v58, %v668_v22 }
  0x65   : > { %v725_v20 = vmul.f32 %v724_v57, %v1203_v59  ;;  %v726_v12 = vmul.f32 %v724_v57, %v1215_v63  ;;  %v727_v19 = vmul.f32 %v724_v57, %v1303_v33  ;;  %v728_v52 = vmul.f32 %v724_v57, %v1307_v32 }
  0x66   : > { %v729_v54 = vmul.f32 %v724_v57, %v1403_v43  ;;  %v730_v5 = vmul.f32 %v724_v57, %v1407_v6  ;;  %v731_v13 = vmul.f32 %v724_v57, %v716_v56  ;;  %v732_v37 = vmul.f32 %v724_v57, %v720_v3 }
  0x67   : > { %v733_v31 = vadd.f32 %v725_v20, %v697_v23  ;;  %v734_v0 = vadd.f32 %v726_v12, %v698_v35  ;;  %v735_v47 = vadd.f32 %v727_v19, %v699_v24  ;;  %v736_v49 = vadd.f32 %v728_v52, %v700_v1 }
  0x68   : > { %v737_v59 = vadd.f32 %v729_v54, %v701_v42  ;;  %v738_v63 = vadd.f32 %v730_v5, %v702_v29  ;;  %v739_v40 = vadd.f32 %v731_v13, %v703_v8  ;;  %v740_v33 = vadd.f32 %v732_v37, %v704_v38 }
  0x69   : > { %v741_v32 = vadd.f32 %v733_v31, %v1441_v60  ;;  %v742_v43 = vadd.f32 %v734_v0, %v1444_v21  ;;  %v743_v6 = vadd.f32 %v735_v47, %v1447_v61  ;;  %v744_v46 = vadd.f32 %v736_v49, %v603_v16 }
  0x6a   : > { %v745_v45 = vadd.f32 %v737_v59, %v604_v18  ;;  %v746_v11 = vadd.f32 %v738_v63, %v605_v27  ;;  %v747_v62 = vadd.f32 %v739_v40, %v606_v50  ;;  %v748_v2 = vadd.f32 %v740_v33, %v607_v30 }
  0x6b   : > { %749 = vst [vmem:[%s179_s30] sm:$0xff] %v741_v32  ;;  %750 = vst [vmem:[%s179_s30 + $0x8] sm:$0xff] %v742_v43 }
  0x6c   : > { %751 = vst [vmem:[%s179_s30 + $0x10] sm:$0xff] %v743_v6  ;;  %752 = vst [vmem:[%s179_s30 + $0x18] sm:$0xff] %v744_v46 }
  0x6d   : > { %753 = vst [vmem:[%s179_s30 + $0x20] sm:$0xff] %v745_v45  ;;  %754 = vst [vmem:[%s179_s30 + $0x28] sm:$0xff] %v746_v11 }
  0x6e   : > { %755 = vst [vmem:[%s179_s30 + $0x30] sm:$0xff] %v747_v62  ;;  %756 = vst [vmem:[%s179_s30 + $0x38] sm:$0xff] %v748_v2 }
  0x6f PF: > { %s12_s11 = sadd.s32 1, %s967_s11   ;;  %s1593_s9 = smov %s963_s10 }
  0x70   : > { %p9_p5 = scmp.ge.s32.totalorder %s12_s11, 5   ;;  %s1594_s10 = smov %s1596_s12 }
  0x72   :  { %11 = sbr.rel (!%p9_p5) target bundleno = 2 (0x2), region = 68 }

</bundles_post_ra>
